<compile_context>
chip_gen: v7x
topology: tpu7x:2x2x1
jax: 0.10.0
libtpu: 0.0.40
codegen_flags: <defaults>
</compile_context>

<pallas_src>
import math
from functools import partial

import jax
import jax.numpy as jnp
from jax.experimental import pallas as pl
from jax.experimental.pallas import tpu as pltpu


def _downsample_kernel(x_ref, w_ref, b_ref, o_ref, *, tanh_dtype):
    # Tanh on EUP (bf16 when operands are bf16, else f32), MXU matmul with f32
    # accumulation, f32 bias add, cast to output dtype.
    xt = jnp.tanh(x_ref[...].astype(tanh_dtype))
    acc = jnp.dot(xt.astype(w_ref.dtype), w_ref[...],
                  preferred_element_type=jnp.float32)
    o_ref[...] = (acc + b_ref[...].astype(jnp.float32)).astype(o_ref.dtype)


def _vmem_capacity_bytes():
    try:
        info = pltpu.get_tpu_info()
        return int(getattr(info, "vmem_capacity_bytes", 64 << 20))
    except Exception:
        return 64 << 20  # be conservative (v7x per-TC size)


def downsample(x, conv_weight, conv_bias, factor, *,
               tile_bytes=8 << 20, tanh_dtype=None):
    """x: (B, T, C); conv_weight: (C, C, factor) [PyTorch Conv1d layout];
    conv_bias: (C,). Returns (B, T//factor, C)."""
    B, T, C = x.shape
    Tp = T // factor
    # Match PyTorch: stride == kernel_size silently drops trailing samples.
    x = x[:, :Tp * factor, :]

    M, K, N = B * Tp, factor * C, C

    x_item = jnp.dtype(x.dtype).itemsize
    w_item = jnp.dtype(conv_weight.dtype).itemsize
    b_item = jnp.dtype(conv_bias.dtype).itemsize
    out_item = x_item

    # tanh dtype: bf16 when the MXU operands are bf16 (v6e/v7x native), else
    # f32.  On v5e (no bf16 EUP/VPU) callers should pass tanh_dtype=f32.
    if tanh_dtype is None:
        tanh_dtype = (jnp.bfloat16 if conv_weight.dtype == jnp.bfloat16
                      else jnp.float32)

    # ---- Lane-density: fuse r consecutive output timesteps per row so the
    # output tile's last dim r*C is an exact multiple of 128 (unmasked vst,
    # dense vregs) and the input tile's last dim is r*K.  r = 1 when C is
    # already a multiple of 128.
    r = 128 // math.gcd(C, 128)
    # Safety cap: keep the block-diagonal weight small (never triggers for
    # realistic audio channel counts); lane density may be lost if it does.
    while r > 1 and (r * K) * (r * N) * w_item > (4 << 20):
        r -= 1
    M_pad = pl.cdiv(M, r) * r
    Mf, Kf, Nf = M_pad // r, r * K, r * N

    # Pure-reshape glue: rows of the (M, K) patch matrix are contiguous over
    # [t*factor + k, ci]; fused row i covers output timesteps i*r .. i*r+r-1.
    x2 = x.reshape(M, K)
    if M_pad != M:
        x2 = jnp.pad(x2, ((0, M_pad - M), (0, 0)))   # tanh(0)=0 -> padded rows
    x2 = x2.reshape(Mf, Kf)                          #   are sliced away below
    # w2[k*C + ci, co] = conv_weight[co, ci, k]
    w2 = jnp.transpose(conv_weight, (2, 1, 0)).reshape(K, N)
    # Block-diagonal RHS: each of the r fused timesteps uses its own copy.
    w_bd = jnp.kron(jnp.eye(r, dtype=w2.dtype), w2)           # (Kf, Nf)
    b_bd = jnp.tile(conv_bias, r).reshape(1, Nf)              # (1, Nf)

    # ---- M tiling: size tm against the full double-buffered VMEM footprint
    # (2x input tile + 2x output tile + 2x weight + bias), with a
    # generation-aware scoped-VMEM budget, and against tile_bytes of input.
    vmem_cap = _vmem_capacity_bytes()                 # 128 MiB v5e/v6e, 64 MiB v7x
    vmem_limit = min(48 << 20, (vmem_cap * 3) // 4)   # scoped limit we request
    usable = (vmem_limit * 7) // 8                    # headroom for compiler scratch

    sub = max(8, 32 // x_item)                        # sublane packing: 8/16/32
    w_bytes = Kf * Nf * w_item + Nf * b_item
    per_row = 2 * Kf * x_item + 2 * Nf * out_item     # double-buffered in + out
    tm_vmem = max(sub, (usable - 2 * w_bytes) // per_row)
    tm_tile = max(sub, tile_bytes // (Kf * x_item))
    tm = max(sub, (min(tm_vmem, tm_tile) // sub) * sub)
    if tm >= Mf:
        tm = Mf                                       # single full-dim block
    grid_m = pl.cdiv(Mf, tm)

    cost = pl.CostEstimate(
        flops=2 * M * K * N,                          # true algorithmic flops
        transcendentals=M * K,
        bytes_accessed=(M * K * x_item + M * N * out_item
                        + K * N * w_item + N * b_item),
    )

    out2 = pl.pallas_call(
        partial(_downsample_kernel, tanh_dtype=tanh_dtype),
        out_shape=jax.ShapeDtypeStruct((Mf, Nf), x.dtype),
        grid=(grid_m,),
        in_specs=[
            pl.BlockSpec((tm, Kf), lambda i: (i, 0)),
            pl.BlockSpec((Kf, Nf), lambda i: (0, 0)),   # weight stays VMEM-resident
            pl.BlockSpec((1, Nf), lambda i: (0, 0)),    # bias stays VMEM-resident
        ],
        out_specs=pl.BlockSpec((tm, Nf), lambda i: (i, 0)),
        compiler_params=pltpu.CompilerParams(
            dimension_semantics=("parallel",),          # shard row tiles across TCs
            vmem_limit_bytes=vmem_limit),
        cost_estimate=cost,
    )(x2, w_bd, b_bd)

    return out2.reshape(M_pad, N)[:M].reshape(B, Tp, N)


def _reference(x, conv_weight, conv_bias, factor):
    # Pure-JAX reference of the PyTorch forward (f32 math).
    B, T, C = x.shape
    Tp = T // factor
    xt = jnp.tanh(x[:, :Tp * factor, :].astype(jnp.float32))   # (B, T', C)
    patches = xt.reshape(B, Tp, factor, C)                     # (B, T', k, ci)
    out = jnp.einsum("btkc,ock->bto", patches,
                     conv_weight.astype(jnp.float32)) + conv_bias.astype(jnp.float32)
    return out


if __name__ == "__main__":
    key = jax.random.PRNGKey(0)
    kx, kw, kb, kx2 = jax.random.split(key, 4)

    # Small shapes consistent with the module: (B, T, C) input, factor=4.
    B, T, C, factor = 2, 32, 16, 4
    x = jax.random.normal(kx, (B, T, C), dtype=jnp.float32)
    fan_in = C * factor
    conv_weight = (jax.random.normal(kw, (C, C, factor), dtype=jnp.float32)
                   / jnp.sqrt(jnp.float32(fan_in)))
    conv_bias = (jax.random.normal(kb, (C,), dtype=jnp.float32)
                 / jnp.sqrt(jnp.float32(fan_in)))

    out = jax.block_until_ready(downsample(x, conv_weight, conv_bias, factor))
    ref = _reference(x, conv_weight, conv_bias, factor)
    assert out.shape == (B, T // factor, C)
    assert jnp.allclose(out.astype(jnp.float32), ref, atol=1e-5, rtol=1e-5), \
        "mismatch vs reference (small)"

    # Longer sequence with a tiny tile budget to exercise the multi-tile
    # pipelined path (grid_m > 1), including a row-padded M.
    T2 = 520                                   # T2 // factor = 130; B*130 = 260
    x_big = jax.random.normal(kx2, (B, T2, C), dtype=jnp.float32)
    out_big = jax.block_until_ready(
        downsample(x_big, conv_weight, conv_bias, factor, tile_bytes=16 << 10))
    ref_big = _reference(x_big, conv_weight, conv_bias, factor)
    assert out_big.shape == (B, T2 // factor, C)
    assert jnp.allclose(out_big.astype(jnp.float32), ref_big, atol=1e-5, rtol=1e-5), \
        "mismatch vs reference (tiled)"

    # bf16 weights/activations path (bf16 tanh + bf16 MXU operands).
    x_bf = x.astype(jnp.bfloat16)
    w_bf = conv_weight.astype(jnp.bfloat16)
    b_bf = conv_bias.astype(jnp.bfloat16)
    out_bf = jax.block_until_ready(downsample(x_bf, w_bf, b_bf, factor))
    ref_bf = _reference(x_bf.astype(jnp.float32), w_bf.astype(jnp.float32),
                        b_bf.astype(jnp.float32), factor)
    assert out_bf.shape == (B, T // factor, C)
    assert jnp.allclose(out_bf.astype(jnp.float32), ref_bf, atol=3e-2, rtol=3e-2), \
        "mismatch vs reference (bf16)"

    print("KERNEL_OK")
</pallas_src>

<mosaic_0001>
module attributes {stable_mosaic.version = 11 : i64} {
  func.func @_downsample_kernel(%arg0: i32, %arg1: memref<2x512xf32, #tpu.memory_space<vmem>>, %arg2: memref<512x128xf32, #tpu.memory_space<vmem>>, %arg3: memref<1x128xf32, #tpu.memory_space<vmem>>, %arg4: memref<2x128xf32, #tpu.memory_space<vmem>>) attributes {dimension_semantics = [#tpu.dimension_semantics<parallel>], iteration_bounds = array<i64: 1>, scalar_prefetch = 0 : i64, scratch_operands = 0 : i64, tpu.core_type = #tpu.core_type<tc>, window_params = [{transform_indices = @transform_0, window_bounds = array<i64: 2, 512>}, {pipeline_mode = #tpu.pipeline_mode<synchronous>, transform_indices = @transform_1, window_bounds = array<i64: 512, 128>}, {pipeline_mode = #tpu.pipeline_mode<synchronous>, transform_indices = @transform_2, window_bounds = array<i64: 1, 128>}, {transform_indices = @transform_3, window_bounds = array<i64: 2, 128>}]} {
    %c0 = arith.constant 0 : index
    %c0_0 = arith.constant 0 : index
    %0 = vector.load %arg1[%c0, %c0_0] : memref<2x512xf32, #tpu.memory_space<vmem>>, vector<2x512xf32>
    %1 = math.tanh %0 : vector<2x512xf32>
    %c0_1 = arith.constant 0 : index
    %c0_2 = arith.constant 0 : index
    %2 = vector.load %arg2[%c0_1, %c0_2] : memref<512x128xf32, #tpu.memory_space<vmem>>, vector<512x128xf32>
    %cst = arith.constant dense<0.000000e+00> : vector<2x128xf32>
    %3 = tpu.matmul %1, %2, %cst {dimension_numbers = #tpu.dot_dimension_numbers<[1], [0], [0], [1], [0, 0, 1, 1], [], []>} : vector<2x512xf32>, vector<512x128xf32>, vector<2x128xf32> -> vector<2x128xf32>
    %c0_3 = arith.constant 0 : index
    %c0_4 = arith.constant 0 : index
    %4 = vector.load %arg3[%c0_3, %c0_4] : memref<1x128xf32, #tpu.memory_space<vmem>>, vector<1x128xf32>
    %5 = vector.broadcast %4 : vector<1x128xf32> to vector<2x128xf32>
    %6 = arith.addf %3, %5 : vector<2x128xf32>
    %c0_5 = arith.constant 0 : index
    %c0_6 = arith.constant 0 : index
    %7 = vector.load %arg4[%c0_5, %c0_6] : memref<2x128xf32, #tpu.memory_space<vmem>>, vector<2x128xf32>
    tpu.vector_store %arg4[%c0_5, %c0_6], %6 {strides = array<i32>} : memref<2x128xf32, #tpu.memory_space<vmem>>, vector<2x128xf32>,
    return
  }
  func.func @transform_0(%arg0: i32) -> (i32, i32) {
    %c0_i32 = arith.constant 0 : i32
    %c0_i32_0 = arith.constant 0 : i32
    return %arg0, %c0_i32 : i32, i32
  }
  func.func @transform_1(%arg0: i32) -> (i32, i32) {
    %c0_i32 = arith.constant 0 : i32
    %c0_i32_0 = arith.constant 0 : i32
    %c0_i32_1 = arith.constant 0 : i32
    return %c0_i32, %c0_i32_0 : i32, i32
  }
  func.func @transform_2(%arg0: i32) -> (i32, i32) {
    %c0_i32 = arith.constant 0 : i32
    %c0_i32_0 = arith.constant 0 : i32
    %c0_i32_1 = arith.constant 0 : i32
    return %c0_i32, %c0_i32_0 : i32, i32
  }
  func.func @transform_3(%arg0: i32) -> (i32, i32) {
    %c0_i32 = arith.constant 0 : i32
    %c0_i32_0 = arith.constant 0 : i32
    return %arg0, %c0_i32 : i32, i32
  }
}

</mosaic_0001>

<bundles_post_ra>
// kernel: tpu_custom_call.1
= control target key start
LH: loop header
LB: loop body
LE: loop exit
PB: predicated region body
PF: predicated region fallthrough
CT: control target
= control target key end

     0   :  { %8 = vsyncpa [#allocation3], 0  ;;  %s580_s0 = inlined_call_operand.hbm [shape: f32[2,512], index: 0, kind: input, shape index: {}]   ;;  %s581_s1 = inlined_call_operand.hbm [shape: f32[512,128], index: 1, kind: input, shape index: {}]   ;;  %s582_s2 = inlined_call_operand.vmem [shape: f32[1,128], index: 2, kind: input, shape index: {}]   ;;  %s583_s3 = inlined_call_operand.hbm [shape: f32[2,128], index: 3, kind: output, shape index: {}]  }
   0x1   :  { %9 = vsyncpa [#allocation6], 0 }
   0x2   :  { %10 = vsyncpa [#allocation4], 0  ;;  %s508_s12 = smov [#allocation2]   ;;  %s509_s14 = smov [#allocation5]  }
   0x3   :  { %s17_s13 = sshll.u32 %s508_s12, 4  ;;  %s26_s15 = sshll.u32 %s509_s14, 4  ;;  %s18_s13 = int_to_ptr.vmem [resolvable:$true] %s17_s13  ;;  %s534_s15 = int_to_ptr.vmem [resolvable:$true] %s26_s15 }
   0x4   :  { %s436_s18 = scalar_lea.hbm %s580_s0, 128 }
   0x5   :  { %p437_p0 = scmp.ne.s32.totalorder %s580_s0, %s436_s18  ;;  %p440_p1 = scmp.lt.u32.totalorder %s436_s18, %s580_s0 }
   0x7   :  { %p442_p2 = pnand %p440_p1, %p437_p0 }
   0x9   :  { %445 = shalt.err (!%p442_p2)
}
   0xa   :  { %s446_s23 = scalar_lea.vmem %s18_s13, 128  ;;  %p451_p4 = scmp.lt.s32.totalorder %s18_s13, %s18_s13 }
   0xb   :  { %p447_p3 = scmp.ne.s32.totalorder %s18_s13, %s446_s23  ;;  %p452_p5 = scmp.lt.s32.totalorder %s446_s23, %s446_s23 }
   0xd   :  { %p453_p6 = por %p452_p5, %p451_p4 }
   0xf   :  { %p454_p7 = pnand %p453_p6, %p447_p3 }
  0x11   :  { %457 = shalt.err (!%p454_p7)
}
  0x12   :  { %20 = dma.hbm_to_vmem [thread:$0]  %s580_s0, 128, %s18_s13, [#allocation3]  }
  0x13   :  { %s458_s28 = scalar_lea.hbm %s581_s1, 8192 }
  0x14   :  { %p459_p8 = scmp.ne.s32.totalorder %s581_s1, %s458_s28  ;;  %p462_p9 = scmp.lt.u32.totalorder %s458_s28, %s581_s1 }
  0x16   :  { %p464_p10 = pnand %p462_p9, %p459_p8 }
  0x18   :  { %467 = shalt.err (!%p464_p10)
}
  0x19   :  { %s468_s6 = scalar_lea.vmem %s534_s15, 8192  ;;  %p473_p12 = scmp.lt.s32.totalorder %s534_s15, %s534_s15 }
  0x1a   :  { %p469_p11 = scmp.ne.s32.totalorder %s534_s15, %s468_s6  ;;  %p474_p13 = scmp.lt.s32.totalorder %s468_s6, %s468_s6 }
  0x1c   :  { %p475_p0 = por %p474_p13, %p473_p12 }
  0x1e   :  { %p476_p1 = pnand %p475_p0, %p469_p11 }
  0x20   :  { %479 = shalt.err (!%p476_p1)
}
  0x21   :  { %s510_s0 = smov 128   ;;  %s511_s7 = smov 8  }
  0x22   :  { %32 = dma.hbm_to_vmem [thread:$0]  %s581_s1, 8192, %s534_s15, [#allocation6], %s510_s0, %s510_s0, %s511_s7  }
  0x23   :  { %502 = dma.done.wait [#allocation3], 128  }
  0x24   :  { %503 = vsyncadd [#allocation3], 4294967168 }
  0x25   :  { %504 = dma.done.wait [#allocation6], 8192  }
  0x26   :  { %505 = vsyncadd [#allocation6], 4294959104  ;;  %v59_v0 = vld [vmem:[#allocation5 + $0x80] sm:$0xff]  ;;  %v60_v1 = vld [vmem:[#allocation5 + $0x88] sm:$0xff]  ;;  %s513_s11 = smov [#allocation7]  }
  0x27   :  { %v43_v2 = vld [vmem:[#allocation5] sm:$0xff]  ;;  %v364_v3 = vpack.c.bf16 %v60_v1, %v59_v0  ;;  %v44_v4 = vld [vmem:[#allocation5 + $0x8] sm:$0xff]  ;;  %v61_v11 = vld [vmem:[#allocation5 + $0x90] sm:$0xff]  ;;  %s283_s12 = sshll.u32 %s513_s11, 4  ;;  %s284_s12 = int_to_ptr.vmem [resolvable:$true] %s283_s12 }
  0x28   :  { %v91_v5 = vld [vmem:[#allocation5 + $0x180] sm:$0xff]  ;;  %v92_v6 = vld [vmem:[#allocation5 + $0x188] sm:$0xff]  ;;  %v366_v7 = vpack.c.bf16 %v44_v4, %v43_v2  ;;  %v62_v13 = vld [vmem:[#allocation5 + $0x98] sm:$0xff]  ;;  %s480_s13 = scalar_lea.vmem %s284_s12, 32  ;;  %p485_p3 = scmp.lt.s32.totalorder %s284_s12, %s284_s12 }
  0x29   :  { %v396_v8 = vpack.c.bf16 %v92_v6, %v91_v5  ;;  %v75_v9 = vld [vmem:[#allocation5 + $0x100] sm:$0xff]  ;;  %v76_v10 = vld [vmem:[#allocation5 + $0x108] sm:$0xff]  ;;  %365 = vmatprep.subr.bf16.mxu0 %v364_v3  ;;  %v45_v14 = vld [vmem:[#allocation5 + $0x10] sm:$0xff]  ;;  %v368_v16 = vpack.c.bf16 %v62_v13, %v61_v11  ;;  %p481_p2 = scmp.ne.s32.totalorder %s284_s12, %s480_s13  ;;  %p486_p4 = scmp.lt.s32.totalorder %s480_s13, %s480_s13 }
  0x2a   :  { %v398_v12 = vpack.c.bf16 %v76_v10, %v75_v9  ;;  %v46_v15 = vld [vmem:[#allocation5 + $0x18] sm:$0xff]  ;;  %367 = vmatpush3.bf16.msra.mxu0 %v366_v7  ;;  %v93_v18 = vld [vmem:[#allocation5 + $0x190] sm:$0xff]  ;;  %v63_v23 = vld [vmem:[#allocation5 + $0xa0] sm:$0xff] }
  0x2b   :  { %397 = vmatprep.subr.bf16.mxu1 %v396_v8  ;;  %v370_v17 = vpack.c.bf16 %v46_v15, %v45_v14  ;;  %v94_v19 = vld [vmem:[#allocation5 + $0x198] sm:$0xff]  ;;  %v77_v20 = vld [vmem:[#allocation5 + $0x110] sm:$0xff]  ;;  %v64_v24 = vld [vmem:[#allocation5 + $0xa8] sm:$0xff]  ;;  %369 = vmatprep.subr.bf16.mxu0 %v368_v16  ;;  %p487_p5 = por %p486_p4, %p485_p3 }
  0x2c   :  { %399 = vmatpush3.bf16.msra.mxu1 %v398_v12  ;;  %v400_v21 = vpack.c.bf16 %v94_v19, %v93_v18  ;;  %v78_v22 = vld [vmem:[#allocation5 + $0x118] sm:$0xff]  ;;  %v372_v26 = vpack.c.bf16 %v64_v24, %v63_v23  ;;  %v47_v27 = vld [vmem:[#allocation5 + $0x20] sm:$0xff]  ;;  %v48_v28 = vld [vmem:[#allocation5 + $0x28] sm:$0xff]  ;;  %v119_v19 = vlaneseq }
  0x2d   :  { %v402_v25 = vpack.c.bf16 %v78_v22, %v77_v20  ;;  %v95_v29 = vld [vmem:[#allocation5 + $0x1a0] sm:$0xff]  ;;  %v96_v30 = vld [vmem:[#allocation5 + $0x1a8] sm:$0xff]  ;;  %v374_v33 = vpack.c.bf16 %v48_v28, %v47_v27  ;;  %v65_v35 = vld [vmem:[#allocation5 + $0xb0] sm:$0xff]  ;;  %p488_p6 = pnand %p487_p5, %p481_p2 }
  0x2e   :  { %401 = vmatprep.subr.bf16.mxu1 %v400_v21  ;;  %v79_v31 = vld [vmem:[#allocation5 + $0x120] sm:$0xff]  ;;  %v80_v32 = vld [vmem:[#allocation5 + $0x128] sm:$0xff]  ;;  %371 = vmatpush3.bf16.msra.mxu0 %v370_v17  ;;  %v404_v34 = vpack.c.bf16 %v96_v30, %v95_v29  ;;  %v66_v36 = vld [vmem:[#allocation5 + $0xb8] sm:$0xff]  ;;  %v512_v17 = vmov 1983009808  }
  0x2f   :  { %v49_v37 = vld [vmem:[#allocation5 + $0x30] sm:$0xff]  ;;  %373 = vmatprep.subr.bf16.mxu0 %v372_v26  ;;  %v406_v38 = vpack.c.bf16 %v80_v32, %v79_v31  ;;  %v376_v39 = vpack.c.bf16 %v66_v36, %v65_v35  ;;  %v50_v40 = vld [vmem:[#allocation5 + $0x38] sm:$0xff]  ;;  %v67_v46 = vld [vmem:[#allocation5 + $0xc0] sm:$0xff]  ;;  %v117_v18 = vunpack.c.l.s4 %v512_v17  ;;  %v120_v32 = vshrl.u32 %v119_v19, 7 }
  0x30   :  { %403 = vmatpush3.bf16.msra.mxu1 %v402_v25  ;;  %v97_v41 = vld [vmem:[#allocation5 + $0x1b0] sm:$0xff]  ;;  %v98_v42 = vld [vmem:[#allocation5 + $0x1b8] sm:$0xff]  ;;  %v68_v47 = vld [vmem:[#allocation5 + $0xc8] sm:$0xff]  ;;  %v378_v48 = vpack.c.bf16 %v50_v40, %v49_v37 }
  0x31   :  { %405 = vmatprep.subr.bf16.mxu1 %v404_v34  ;;  %v408_v43 = vpack.c.bf16 %v98_v42, %v97_v41  ;;  %v81_v44 = vld [vmem:[#allocation5 + $0x130] sm:$0xff]  ;;  %v82_v45 = vld [vmem:[#allocation5 + $0x138] sm:$0xff]  ;;  %v99_v49 = vld [vmem:[#allocation5 + $0x1c0] sm:$0xff]  ;;  %v380_v52 = vpack.c.bf16 %v68_v47, %v67_v46  ;;  %v118_v31 = vunpack.c.0.s8 %v117_v18 }
  0x32   :  { %375 = vmatpush3.bf16.msra.mxu0 %v374_v33  ;;  %v100_v50 = vld [vmem:[#allocation5 + $0x1c8] sm:$0xff]  ;;  %v410_v51 = vpack.c.bf16 %v82_v45, %v81_v44  ;;  %v51_v53 = vld [vmem:[#allocation5 + $0x40] sm:$0xff]  ;;  %v69_v58 = vld [vmem:[#allocation5 + $0xd0] sm:$0xff] }
  0x33   :  { %377 = vmatprep.subr.bf16.mxu0 %v376_v39  ;;  %v52_v54 = vld [vmem:[#allocation5 + $0x48] sm:$0xff]  ;;  %v83_v55 = vld [vmem:[#allocation5 + $0x140] sm:$0xff]  ;;  %v412_v56 = vpack.c.bf16 %v100_v50, %v99_v49  ;;  %v70_v59 = vld [vmem:[#allocation5 + $0xd8] sm:$0xff] }
  0x34   :  { %407 = vmatpush3.bf16.msra.mxu1 %v406_v38  ;;  %v84_v57 = vld [vmem:[#allocation5 + $0x148] sm:$0xff]  ;;  %v101_v60 = vld [vmem:[#allocation5 + $0x1d0] sm:$0xff]  ;;  %v102_v61 = vld [vmem:[#allocation5 + $0x1d8] sm:$0xff]  ;;  %v382_v62 = vpack.c.bf16 %v52_v54, %v51_v53  ;;  %v384_v0 = vpack.c.bf16 %v70_v59, %v69_v58  ;;  %v121_v38 = vsub.s32 %v118_v31, %v120_v32 }
  0x35   :  { %409 = vmatprep.subr.bf16.mxu1 %v408_v43  ;;  %v414_v63 = vpack.c.bf16 %v84_v57, %v83_v55  ;;  %v53_v1 = vld [vmem:[#allocation5 + $0x50] sm:$0xff]  ;;  %v54_v2 = vld [vmem:[#allocation5 + $0x58] sm:$0xff]  ;;  %v416_v4 = vpack.c.bf16 %v102_v61, %v101_v60  ;;  %v71_v6 = vld [vmem:[#allocation5 + $0xe0] sm:$0xff] }
  0x36   :  { %379 = vmatpush3.bf16.msra.mxu0 %v378_v48  ;;  %v85_v3 = vld [vmem:[#allocation5 + $0x150] sm:$0xff]  ;;  %v86_v5 = vld [vmem:[#allocation5 + $0x158] sm:$0xff]  ;;  %v72_v7 = vld [vmem:[#allocation5 + $0xe8] sm:$0xff]  ;;  %v386_v10 = vpack.c.bf16 %v54_v2, %v53_v1 }
  0x37   :  { %381 = vmatprep.subr.bf16.mxu0 %v380_v52  ;;  %v103_v8 = vld [vmem:[#allocation5 + $0x1e0] sm:$0xff]  ;;  %v104_v9 = vld [vmem:[#allocation5 + $0x1e8] sm:$0xff]  ;;  %v418_v12 = vpack.c.bf16 %v86_v5, %v85_v3  ;;  %v388_v13 = vpack.c.bf16 %v72_v7, %v71_v6  ;;  %v41_v16 = vld [vmem:[#allocation2] sm:$0xff] }
  0x38   :  { %411 = vmatpush3.bf16.msra.mxu1 %v410_v51  ;;  %v55_v11 = vld [vmem:[#allocation5 + $0x60] sm:$0xff]  ;;  %v56_v14 = vld [vmem:[#allocation5 + $0x68] sm:$0xff]  ;;  %v420_v20 = vpack.c.bf16 %v104_v9, %v103_v8  ;;  %v73_v22 = vld [vmem:[#allocation5 + $0xf0] sm:$0xff]  ;;  %434 = vtanh.f32 %v41_v16 }
  0x39   :  { %413 = vmatprep.subr.bf16.mxu1 %v412_v56  ;;  %v87_v15 = vld [vmem:[#allocation5 + $0x160] sm:$0xff]  ;;  %v88_v21 = vld [vmem:[#allocation5 + $0x168] sm:$0xff]  ;;  %v74_v23 = vld [vmem:[#allocation5 + $0xf8] sm:$0xff]  ;;  %v390_v26 = vpack.c.bf16 %v56_v14, %v55_v11 }
  0x3a   :  { %383 = vmatpush3.bf16.msra.mxu0 %v382_v62  ;;  %v105_v24 = vld [vmem:[#allocation5 + $0x1f0] sm:$0xff]  ;;  %v106_v25 = vld [vmem:[#allocation5 + $0x1f8] sm:$0xff]  ;;  %v422_v27 = vpack.c.bf16 %v88_v21, %v87_v15  ;;  %v392_v28 = vpack.c.bf16 %v74_v23, %v73_v22 }
  0x3b   :  { %385 = vmatprep.subr.bf16.mxu0 %v384_v0  ;;  %v57_v29 = vld [vmem:[#allocation5 + $0x70] sm:$0xff]  ;;  %v58_v30 = vld [vmem:[#allocation5 + $0x78] sm:$0xff]  ;;  %v424_v33 = vpack.c.bf16 %v106_v25, %v105_v24 }
  0x3c   :  { %415 = vmatpush3.bf16.msra.mxu1 %v414_v63  ;;  %v89_v34 = vld [vmem:[#allocation5 + $0x170] sm:$0xff]  ;;  %v90_v35 = vld [vmem:[#allocation5 + $0x178] sm:$0xff]  ;;  %v394_v36 = vpack.c.bf16 %v58_v30, %v57_v29 }
  0x3d   :  { %417 = vmatprep.subr.bf16.mxu1 %v416_v4  ;;  %v426_v37 = vpack.c.bf16 %v90_v35, %v89_v34  ;;  %v293_v46 = vld [vmem:[%s582_s2] ss:$0 sm:$0xff] }
  0x3e   :  { %387 = vmatpush3.bf16.msra.mxu0 %v386_v10 }
  0x3f   :  { %389 = vmatprep.subr.bf16.mxu0 %v388_v13 }
  0x40   :  { %419 = vmatpush3.bf16.msra.mxu1 %v418_v12 }
  0x41   :  { %421 = vmatprep.subr.bf16.mxu1 %v420_v20 }
  0x42   :  { %391 = vmatpush3.bf16.msra.mxu0 %v390_v26  ;;  %v435_v39 = vpop.eup %434 }
  0x43   :  { %393 = vmatprep.subr.bf16.mxu0 %v392_v28  ;;  %v122_v40 = vrot.slane %v435_v39, %v121_v38  ;;  %v115_v41 = vcombine.high %v435_v39, %v435_v39 }
  0x44   :  { %423 = vmatpush3.bf16.msra.mxu1 %v422_v27 }
  0x45   :  { %425 = vmatprep.subr.bf16.mxu1 %v424_v33  ;;  %v130_v42 = vcombine.high %v122_v40, %v122_v40  ;;  %v129_v43 = vrot.slane %v115_v41, %v121_v38 }
  0x46   :  { %395 = vmatpush3.bf16.msra.mxu0 %v394_v36 }
  0x47   :  { %200 = vmatprep.mubr.f32.mxu0 %v130_v42  ;;  %v131_v44 = vcombine.high %v129_v43, %v129_v43 }
  0x48   :  { %427 = vmatpush3.bf16.msra.mxu1 %v426_v37 }
  0x49   :  { %201 = vmatmul.mubr.f32.vlgmr.msra.gmra.mrb[0].mxu0 %v122_v40  ;;  %270 = vmatprep.mubr.f32.mxu1 %v131_v44 }
  0x4b   :  { %271 = vmatmul.mubr.f32.vlgmr.msra.gmra.mrb[0].mxu1 %v129_v43 }
 0x11c   :  { %v326_v45 = vpop.f32.mrb[0].mxu0 }
 0x11d   :  { %v327_v47 = vpop.f32.mrb[1].mxu0 }
 0x11e   :  { %v328_v48 = vadd.f32 %v327_v47, %v326_v45  ;;  %v361_v49 = vpop.f32.mrb[0].mxu1 }
 0x11f   :  { %v362_v50 = vpop.f32.mrb[1].mxu1 }
 0x120   :  { %v203_v51 = vadd.f32 %v328_v48, %v293_v46  ;;  %v363_v52 = vadd.f32 %v362_v50, %v361_v49 }
 0x122   :  { %v273_v53 = vadd.f32 %v363_v52, %v203_v51 }
 0x124   :  { %276 = vst [vmem:[#allocation7] sm:$0x3] %v273_v53 }
 0x125   :  { %491 = shalt.err (!%p488_p6)
}
 0x126   :  { %s492_s15 = scalar_lea.hbm %s583_s3, 32 }
 0x127   :  { %p493_p7 = scmp.ne.s32.totalorder %s583_s3, %s492_s15  ;;  %p496_p8 = scmp.lt.u32.totalorder %s492_s15, %s583_s3 }
 0x129   :  { %p498_p9 = pnand %p496_p8, %p493_p7 }
 0x12b   :  { %501 = shalt.err (!%p498_p9)
}
 0x12c   :  { %286 = dma.vmem_to_hbm [thread:$0]  %s284_s12, 32, %s583_s3, [#allocation4]  }
 0x12d   :  { %506 = dma.done.wait [#allocation4], 32  }
 0x12e   :  { %507 = vsyncadd [#allocation4], 4294967264 }
 0x12f   :  { %290 = vsyncpa [#allocation3], 1 }
 0x130   :  { %291 = vsyncpa [#allocation6], 1 }
 0x131   :  { %292 = vsyncpa [#allocation4], 1 }

</bundles_post_ra>
